<compile_context>
chip_gen: v7x
topology: tpu7x:2x2x1
jax: 0.10.0
libtpu: 0.0.40
codegen_flags: <defaults>
</compile_context>

<pallas_src>
import functools

import jax
import jax.numpy as jnp
from jax.experimental import pallas as pl
from jax.experimental.pallas import tpu as pltpu


def _vmem_specs(n):
    return [pl.BlockSpec(memory_space=pltpu.MemorySpace.VMEM) for _ in range(n)]


# ----------------------------------------------------------------------------
# Fully fused forward kernel:
#   GIN stack -> MultiPool (mean/min/max) -> readout MLP + LayerNorms -> BCE
# ----------------------------------------------------------------------------
def _glass_fused_kernel(*refs, num_layers, num_segments):
    it = iter(refs)
    agg_ref = next(it)                                   # (N, N)   bf16
    x_ref = next(it)                                     # (N, Din) f32
    gin_refs = [next(it) for _ in range(4 * num_layers)]  # w1,b1,w2,b2 per layer
    sel_ref = next(it)                                   # (S, N)   f32
    rw1, rb1, g1, be1, rw2, rb2, g2, be2, rw3, rb3 = [next(it) for _ in range(10)]
    y_ref = next(it)                                     # (S, 1)   f32
    logit_ref = next(it)                                 # (S, 1)   f32 out
    loss_ref = next(it)                                  # (1, 1)   f32 out

    # ---- GIN stack: h <- MLP((A + I) @ h), weights in bf16, f32 accumulate.
    agg = agg_ref[...]                                   # already bf16
    h = x_ref[...]                                       # f32
    for l in range(num_layers):
        w1 = gin_refs[4 * l][...]                        # bf16 (Din, H)
        b1 = gin_refs[4 * l + 1][...]                    # f32  (1, H)
        w2 = gin_refs[4 * l + 2][...]                    # bf16 (H, H)
        b2 = gin_refs[4 * l + 3][...]                    # f32  (1, H)
        t = jnp.dot(agg, h.astype(jnp.bfloat16),
                    preferred_element_type=jnp.float32)
        t = jnp.dot(t.astype(jnp.bfloat16), w1,
                    preferred_element_type=jnp.float32) + b1
        t = jnp.maximum(t, 0.0)
        t = jnp.dot(t.astype(jnp.bfloat16), w2,
                    preferred_element_type=jnp.float32) + b2
        if l < num_layers - 1:
            t = jnp.maximum(t, 0.0)
        h = t                                            # (N, H) f32

    # ---- MultiPool: gather + segment reductions fused via a selection matrix.
    # sel[s, n] = multiplicity of node n in batch s, so sel @ h is the segment
    # sum over the gathered rows (matches segment_csr over embs[batches]).
    sel = sel_ref[...]                                   # (S, N) f32
    counts = jnp.maximum(jnp.sum(sel, axis=1, keepdims=True), 1.0)   # (S, 1)
    sums = jnp.dot(sel, h, preferred_element_type=jnp.float32)       # (S, H)
    mean = sums / counts                                              # (S, H)

    # Masked min / max per segment via broadcast + sublane reduce (no loops,
    # no per-row masked stores).  Sentinels are Python literals (not captured
    # jnp constants).
    selb = sel[:, :, None] > 0.5                          # (S, N, 1) bool
    h3 = h[None, :, :]                                    # (1, N, H)
    mn = jnp.min(jnp.where(selb, h3, 3.0e38), axis=1)     # (S, H)
    mx = jnp.max(jnp.where(selb, h3, -3.0e38), axis=1)    # (S, H)

    # ---- Readout MLP (Linear->ReLU->LN->Linear->LN->ReLU->Linear) + BCE loss.
    def layernorm(t, g, b):
        mu = jnp.mean(t, axis=-1, keepdims=True)
        var = jnp.mean((t - mu) ** 2, axis=-1, keepdims=True)
        return (t - mu) * jax.lax.rsqrt(var + 1e-5) * g + b

    hdim = mean.shape[1]
    # First Linear applied to the virtual concat [mean | min | max] by
    # splitting its weight — avoids materialising an unaligned lane concat.
    r = (jnp.dot(mean, rw1[0:hdim, :], preferred_element_type=jnp.float32)
         + jnp.dot(mn, rw1[hdim:2 * hdim, :], preferred_element_type=jnp.float32)
         + jnp.dot(mx, rw1[2 * hdim:3 * hdim, :], preferred_element_type=jnp.float32)
         + rb1[...])
    r = jnp.maximum(r, 0.0)
    r = layernorm(r, g1[...], be1[...])
    r = jnp.dot(r, rw2[...], preferred_element_type=jnp.float32) + rb2[...]
    r = layernorm(r, g2[...], be2[...])
    r = jnp.maximum(r, 0.0)
    logits = jnp.dot(r, rw3[...], preferred_element_type=jnp.float32) + rb3[...]
    logit_ref[...] = logits

    # BCEWithLogitsLoss, mean reduction (numerically stable form).
    y = y_ref[...]
    elem = (jnp.maximum(logits, 0.0) - logits * y
            + jnp.log(1.0 + jnp.exp(-jnp.abs(logits))))
    loss_ref[...] = jnp.mean(elem, keepdims=True)


# ----------------------------------------------------------------------------
# Parameter init (deterministic, synthetic)
# ----------------------------------------------------------------------------
def init_params(key, in_dim, hidden, layers):
    dims = [in_dim + 1] + [hidden] * layers
    keys = iter(jax.random.split(key, 4 * layers + 8))
    gin = []
    for l in range(layers):
        din = dims[l]
        w1 = jax.random.normal(next(keys), (din, hidden), jnp.float32) / jnp.sqrt(din)
        b1 = jnp.zeros((1, hidden), jnp.float32)
        w2 = jax.random.normal(next(keys), (hidden, hidden), jnp.float32) / jnp.sqrt(hidden)
        b2 = jnp.zeros((1, hidden), jnp.float32)
        gin.append((w1, b1, w2, b2))
    h3 = hidden * 3
    rw1 = jax.random.normal(next(keys), (h3, hidden), jnp.float32) / jnp.sqrt(h3)
    rb1 = jnp.zeros((1, hidden), jnp.float32)
    g1 = jnp.ones((1, hidden), jnp.float32)
    be1 = jnp.zeros((1, hidden), jnp.float32)
    rw2 = jax.random.normal(next(keys), (hidden, hidden), jnp.float32) / jnp.sqrt(hidden)
    rb2 = jnp.zeros((1, hidden), jnp.float32)
    g2 = jnp.ones((1, hidden), jnp.float32)
    be2 = jnp.zeros((1, hidden), jnp.float32)
    rw3 = jax.random.normal(next(keys), (hidden, 1), jnp.float32) / jnp.sqrt(hidden)
    rb3 = jnp.zeros((1, 1), jnp.float32)
    readout = (rw1, rb1, g1, be1, rw2, rb2, g2, be2, rw3, rb3)
    return {"gin": gin, "readout": readout}


# ----------------------------------------------------------------------------
# Forward: host-side glue (graph -> dense tensors) + one fused Pallas kernel
# ----------------------------------------------------------------------------
def glass_forward(params, x, ei, ew, batches_list, labels):
    n = x.shape[0]
    s = len(batches_list)
    batches = jnp.concatenate(batches_list)

    # batch-membership feature appended to x (as in predict())
    batch_feat = jnp.zeros((n, 1), jnp.float32).at[batches].set(1.0)
    xin = jnp.concatenate([x, batch_feat], axis=1)

    # dense weighted adjacency: messages flow source -> target; GIN eps = 0
    adj = jnp.zeros((n, n), jnp.float32).at[ei[1], ei[0]].add(ew)
    agg = (adj + jnp.eye(n, dtype=jnp.float32)).astype(jnp.bfloat16)

    # segment selection matrix: sel[s, node] = #times node appears in batch s
    seg_ids = jnp.concatenate(
        [jnp.full((int(b.shape[0]),), i, jnp.int32)
         for i, b in enumerate(batches_list)])
    sel = jnp.zeros((s, n), jnp.float32).at[seg_ids, batches].add(1.0)

    # GIN weights pre-cast to bf16 (halves VMEM/HBM traffic; biases stay f32)
    gin_flat = []
    for (w1, b1, w2, b2) in params["gin"]:
        gin_flat += [w1.astype(jnp.bfloat16), b1, w2.astype(jnp.bfloat16), b2]
    num_layers = len(params["gin"])

    kernel = functools.partial(_glass_fused_kernel,
                               num_layers=num_layers, num_segments=s)
    n_in = 2 + 4 * num_layers + 1 + 10 + 1
    logits, loss = pl.pallas_call(
        kernel,
        out_shape=(jax.ShapeDtypeStruct((s, 1), jnp.float32),
                   jax.ShapeDtypeStruct((1, 1), jnp.float32)),
        in_specs=_vmem_specs(n_in),
        out_specs=(pl.BlockSpec(memory_space=pltpu.MemorySpace.VMEM),
                   pl.BlockSpec(memory_space=pltpu.MemorySpace.VMEM)),
    )(agg, xin, *gin_flat, sel, *params["readout"], labels)
    return logits, loss[0, 0]


if __name__ == "__main__":
    key = jax.random.PRNGKey(0)
    in_dim, hidden, layers = 7, 32, 3
    n_nodes, n_edges = 16, 40

    k1, k2, k3, kp = jax.random.split(key, 4)
    x = jax.random.normal(k1, (n_nodes, in_dim), jnp.float32)
    ei = jax.random.randint(k2, (2, n_edges), 0, n_nodes, dtype=jnp.int32)
    ew = jax.random.uniform(k3, (n_edges,), jnp.float32)
    batches_list = [jnp.array([0, 1, 2, 3, 4, 5], jnp.int32),
                    jnp.array([8, 9, 10, 11, 12], jnp.int32)]
    labels = jnp.array([[1.0], [0.0]], jnp.float32)

    params = init_params(kp, in_dim, hidden, layers)
    logits, loss = glass_forward(params, x, ei, ew, batches_list, labels)
    jax.block_until_ready((logits, loss))
    assert logits.shape == (2, 1) and bool(jnp.isfinite(loss))
    print("KERNEL_OK")
</pallas_src>

<mosaic_0001>
module attributes {stable_mosaic.version = 11 : i64} {
  func.func @_glass_fused_kernel(%arg0: memref<16x16xbf16, #tpu.memory_space<vmem>>, %arg1: memref<16x8xf32, #tpu.memory_space<vmem>>, %arg2: memref<8x32xbf16, #tpu.memory_space<vmem>>, %arg3: memref<1x32xf32, #tpu.memory_space<vmem>>, %arg4: memref<32x32xbf16, #tpu.memory_space<vmem>>, %arg5: memref<1x32xf32, #tpu.memory_space<vmem>>, %arg6: memref<32x32xbf16, #tpu.memory_space<vmem>>, %arg7: memref<1x32xf32, #tpu.memory_space<vmem>>, %arg8: memref<32x32xbf16, #tpu.memory_space<vmem>>, %arg9: memref<1x32xf32, #tpu.memory_space<vmem>>, %arg10: memref<32x32xbf16, #tpu.memory_space<vmem>>, %arg11: memref<1x32xf32, #tpu.memory_space<vmem>>, %arg12: memref<32x32xbf16, #tpu.memory_space<vmem>>, %arg13: memref<1x32xf32, #tpu.memory_space<vmem>>, %arg14: memref<2x16xf32, #tpu.memory_space<vmem>>, %arg15: memref<96x32xf32, #tpu.memory_space<vmem>>, %arg16: memref<1x32xf32, #tpu.memory_space<vmem>>, %arg17: memref<1x32xf32, #tpu.memory_space<vmem>>, %arg18: memref<1x32xf32, #tpu.memory_space<vmem>>, %arg19: memref<32x32xf32, #tpu.memory_space<vmem>>, %arg20: memref<1x32xf32, #tpu.memory_space<vmem>>, %arg21: memref<1x32xf32, #tpu.memory_space<vmem>>, %arg22: memref<1x32xf32, #tpu.memory_space<vmem>>, %arg23: memref<32x1xf32, #tpu.memory_space<vmem>>, %arg24: memref<1x1xf32, #tpu.memory_space<vmem>>, %arg25: memref<2x1xf32, #tpu.memory_space<vmem>>, %arg26: memref<2x1xf32, #tpu.memory_space<vmem>>, %arg27: memref<1x1xf32, #tpu.memory_space<vmem>>) attributes {dimension_semantics = [], scalar_prefetch = 0 : i64, scratch_operands = 0 : i64, tpu.core_type = #tpu.core_type<tc>} {
    %c0 = arith.constant 0 : index
    %c0_0 = arith.constant 0 : index
    %0 = vector.load %arg0[%c0, %c0_0] : memref<16x16xbf16, #tpu.memory_space<vmem>>, vector<16x16xbf16>
    %c0_1 = arith.constant 0 : index
    %c0_2 = arith.constant 0 : index
    %1 = vector.load %arg1[%c0_1, %c0_2] : memref<16x8xf32, #tpu.memory_space<vmem>>, vector<16x8xf32>
    %c0_3 = arith.constant 0 : index
    %c0_4 = arith.constant 0 : index
    %2 = vector.load %arg2[%c0_3, %c0_4] : memref<8x32xbf16, #tpu.memory_space<vmem>>, vector<8x32xbf16>
    %c0_5 = arith.constant 0 : index
    %c0_6 = arith.constant 0 : index
    %3 = vector.load %arg3[%c0_5, %c0_6] : memref<1x32xf32, #tpu.memory_space<vmem>>, vector<1x32xf32>
    %c0_7 = arith.constant 0 : index
    %c0_8 = arith.constant 0 : index
    %4 = vector.load %arg4[%c0_7, %c0_8] : memref<32x32xbf16, #tpu.memory_space<vmem>>, vector<32x32xbf16>
    %c0_9 = arith.constant 0 : index
    %c0_10 = arith.constant 0 : index
    %5 = vector.load %arg5[%c0_9, %c0_10] : memref<1x32xf32, #tpu.memory_space<vmem>>, vector<1x32xf32>
    %6 = arith.truncf %1 : vector<16x8xf32> to vector<16x8xbf16>
    %cst = arith.constant dense<0.000000e+00> : vector<16x8xf32>
    %7 = tpu.matmul %0, %6, %cst {dimension_numbers = #tpu.dot_dimension_numbers<[1], [0], [0], [1], [0, 0, 1, 1], [], []>} : vector<16x16xbf16>, vector<16x8xbf16>, vector<16x8xf32> -> vector<16x8xf32>
    %8 = arith.truncf %7 : vector<16x8xf32> to vector<16x8xbf16>
    %cst_11 = arith.constant dense<0.000000e+00> : vector<16x32xf32>
    %9 = tpu.matmul %8, %2, %cst_11 {dimension_numbers = #tpu.dot_dimension_numbers<[1], [0], [0], [1], [0, 0, 1, 1], [], []>} : vector<16x8xbf16>, vector<8x32xbf16>, vector<16x32xf32> -> vector<16x32xf32>
    %10 = vector.broadcast %3 : vector<1x32xf32> to vector<16x32xf32>
    %11 = arith.addf %9, %10 : vector<16x32xf32>
    %cst_12 = arith.constant 0.000000e+00 : f32
    %12 = vector.broadcast %cst_12 : f32 to vector<16x32xf32>
    %13 = arith.maximumf %11, %12 : vector<16x32xf32>
    %14 = arith.truncf %13 : vector<16x32xf32> to vector<16x32xbf16>
    %cst_13 = arith.constant dense<0.000000e+00> : vector<16x32xf32>
    %15 = tpu.matmul %14, %4, %cst_13 {dimension_numbers = #tpu.dot_dimension_numbers<[1], [0], [0], [1], [0, 0, 1, 1], [], []>} : vector<16x32xbf16>, vector<32x32xbf16>, vector<16x32xf32> -> vector<16x32xf32>
    %16 = vector.broadcast %5 : vector<1x32xf32> to vector<16x32xf32>
    %17 = arith.addf %15, %16 : vector<16x32xf32>
    %cst_14 = arith.constant 0.000000e+00 : f32
    %18 = vector.broadcast %cst_14 : f32 to vector<16x32xf32>
    %19 = arith.maximumf %17, %18 : vector<16x32xf32>
    %c0_15 = arith.constant 0 : index
    %c0_16 = arith.constant 0 : index
    %20 = vector.load %arg6[%c0_15, %c0_16] : memref<32x32xbf16, #tpu.memory_space<vmem>>, vector<32x32xbf16>
    %c0_17 = arith.constant 0 : index
    %c0_18 = arith.constant 0 : index
    %21 = vector.load %arg7[%c0_17, %c0_18] : memref<1x32xf32, #tpu.memory_space<vmem>>, vector<1x32xf32>
    %c0_19 = arith.constant 0 : index
    %c0_20 = arith.constant 0 : index
    %22 = vector.load %arg8[%c0_19, %c0_20] : memref<32x32xbf16, #tpu.memory_space<vmem>>, vector<32x32xbf16>
    %c0_21 = arith.constant 0 : index
    %c0_22 = arith.constant 0 : index
    %23 = vector.load %arg9[%c0_21, %c0_22] : memref<1x32xf32, #tpu.memory_space<vmem>>, vector<1x32xf32>
    %24 = arith.truncf %19 : vector<16x32xf32> to vector<16x32xbf16>
    %cst_23 = arith.constant dense<0.000000e+00> : vector<16x32xf32>
    %25 = tpu.matmul %0, %24, %cst_23 {dimension_numbers = #tpu.dot_dimension_numbers<[1], [0], [0], [1], [0, 0, 1, 1], [], []>} : vector<16x16xbf16>, vector<16x32xbf16>, vector<16x32xf32> -> vector<16x32xf32>
    %26 = arith.truncf %25 : vector<16x32xf32> to vector<16x32xbf16>
    %cst_24 = arith.constant dense<0.000000e+00> : vector<16x32xf32>
    %27 = tpu.matmul %26, %20, %cst_24 {dimension_numbers = #tpu.dot_dimension_numbers<[1], [0], [0], [1], [0, 0, 1, 1], [], []>} : vector<16x32xbf16>, vector<32x32xbf16>, vector<16x32xf32> -> vector<16x32xf32>
    %28 = vector.broadcast %21 : vector<1x32xf32> to vector<16x32xf32>
    %29 = arith.addf %27, %28 : vector<16x32xf32>
    %cst_25 = arith.constant 0.000000e+00 : f32
    %30 = vector.broadcast %cst_25 : f32 to vector<16x32xf32>
    %31 = arith.maximumf %29, %30 : vector<16x32xf32>
    %32 = arith.truncf %31 : vector<16x32xf32> to vector<16x32xbf16>
    %cst_26 = arith.constant dense<0.000000e+00> : vector<16x32xf32>
    %33 = tpu.matmul %32, %22, %cst_26 {dimension_numbers = #tpu.dot_dimension_numbers<[1], [0], [0], [1], [0, 0, 1, 1], [], []>} : vector<16x32xbf16>, vector<32x32xbf16>, vector<16x32xf32> -> vector<16x32xf32>
    %34 = vector.broadcast %23 : vector<1x32xf32> to vector<16x32xf32>
    %35 = arith.addf %33, %34 : vector<16x32xf32>
    %cst_27 = arith.constant 0.000000e+00 : f32
    %36 = vector.broadcast %cst_27 : f32 to vector<16x32xf32>
    %37 = arith.maximumf %35, %36 : vector<16x32xf32>
    %c0_28 = arith.constant 0 : index
    %c0_29 = arith.constant 0 : index
    %38 = vector.load %arg10[%c0_28, %c0_29] : memref<32x32xbf16, #tpu.memory_space<vmem>>, vector<32x32xbf16>
    %c0_30 = arith.constant 0 : index
    %c0_31 = arith.constant 0 : index
    %39 = vector.load %arg11[%c0_30, %c0_31] : memref<1x32xf32, #tpu.memory_space<vmem>>, vector<1x32xf32>
    %c0_32 = arith.constant 0 : index
    %c0_33 = arith.constant 0 : index
    %40 = vector.load %arg12[%c0_32, %c0_33] : memref<32x32xbf16, #tpu.memory_space<vmem>>, vector<32x32xbf16>
    %c0_34 = arith.constant 0 : index
    %c0_35 = arith.constant 0 : index
    %41 = vector.load %arg13[%c0_34, %c0_35] : memref<1x32xf32, #tpu.memory_space<vmem>>, vector<1x32xf32>
    %42 = arith.truncf %37 : vector<16x32xf32> to vector<16x32xbf16>
    %cst_36 = arith.constant dense<0.000000e+00> : vector<16x32xf32>
    %43 = tpu.matmul %0, %42, %cst_36 {dimension_numbers = #tpu.dot_dimension_numbers<[1], [0], [0], [1], [0, 0, 1, 1], [], []>} : vector<16x16xbf16>, vector<16x32xbf16>, vector<16x32xf32> -> vector<16x32xf32>
    %44 = arith.truncf %43 : vector<16x32xf32> to vector<16x32xbf16>
    %cst_37 = arith.constant dense<0.000000e+00> : vector<16x32xf32>
    %45 = tpu.matmul %44, %38, %cst_37 {dimension_numbers = #tpu.dot_dimension_numbers<[1], [0], [0], [1], [0, 0, 1, 1], [], []>} : vector<16x32xbf16>, vector<32x32xbf16>, vector<16x32xf32> -> vector<16x32xf32>
    %46 = vector.broadcast %39 : vector<1x32xf32> to vector<16x32xf32>
    %47 = arith.addf %45, %46 : vector<16x32xf32>
    %cst_38 = arith.constant 0.000000e+00 : f32
    %48 = vector.broadcast %cst_38 : f32 to vector<16x32xf32>
    %49 = arith.maximumf %47, %48 : vector<16x32xf32>
    %50 = arith.truncf %49 : vector<16x32xf32> to vector<16x32xbf16>
    %cst_39 = arith.constant dense<0.000000e+00> : vector<16x32xf32>
    %51 = tpu.matmul %50, %40, %cst_39 {dimension_numbers = #tpu.dot_dimension_numbers<[1], [0], [0], [1], [0, 0, 1, 1], [], []>} : vector<16x32xbf16>, vector<32x32xbf16>, vector<16x32xf32> -> vector<16x32xf32>
    %52 = vector.broadcast %41 : vector<1x32xf32> to vector<16x32xf32>
    %53 = arith.addf %51, %52 : vector<16x32xf32>
    %c0_40 = arith.constant 0 : index
    %c0_41 = arith.constant 0 : index
    %54 = vector.load %arg14[%c0_40, %c0_41] : memref<2x16xf32, #tpu.memory_space<vmem>>, vector<2x16xf32>
    %cst_42 = arith.constant dense<0.000000e+00> : vector<2xf32>
    %55 = vector.multi_reduction <add>, %54, %cst_42 [1] : vector<2x16xf32> to vector<2xf32>
    %56 = vector.shape_cast %55 : vector<2xf32> to vector<2x1xf32>
    %cst_43 = arith.constant 1.000000e+00 : f32
    %57 = vector.broadcast %cst_43 : f32 to vector<2x1xf32>
    %58 = arith.maximumf %56, %57 : vector<2x1xf32>
    %cst_44 = arith.constant dense<0.000000e+00> : vector<2x32xf32>
    %59 = tpu.matmul %54, %53, %cst_44 {dimension_numbers = #tpu.dot_dimension_numbers<[1], [0], [0], [1], [0, 0, 1, 1], [], []>} : vector<2x16xf32>, vector<16x32xf32>, vector<2x32xf32> -> vector<2x32xf32>
    %60 = vector.broadcast %58 : vector<2x1xf32> to vector<2x32xf32>
    %61 = arith.divf %59, %60 : vector<2x32xf32>
    %62 = vector.shape_cast %54 : vector<2x16xf32> to vector<2x16x1xf32>
    %cst_45 = arith.constant 5.000000e-01 : f32
    %63 = vector.broadcast %cst_45 : f32 to vector<2x16x1xf32>
    %64 = arith.cmpf ogt, %62, %63 : vector<2x16x1xf32>
    %65 = vector.shape_cast %53 : vector<16x32xf32> to vector<1x16x32xf32>
    %cst_46 = arith.constant 3.000000e+38 : f32
    %66 = vector.shape_cast %64 : vector<2x16x1xi1> to vector<2x16x1xi1>
    %67 = vector.broadcast %66 : vector<2x16x1xi1> to vector<2x16x32xi1>
    %68 = vector.shape_cast %65 : vector<1x16x32xf32> to vector<1x16x32xf32>
    %69 = vector.broadcast %68 : vector<1x16x32xf32> to vector<2x16x32xf32>
    %70 = vector.broadcast %cst_46 : f32 to vector<2x16x32xf32>
    %71 = arith.select %67, %69, %70 : vector<2x16x32xi1>, vector<2x16x32xf32>
    %cst_47 = arith.constant dense<0x7F800000> : vector<2x32xf32>
    %72 = vector.multi_reduction <minimumf>, %71, %cst_47 [1] : vector<2x16x32xf32> to vector<2x32xf32>
    %cst_48 = arith.constant -3.000000e+38 : f32
    %73 = vector.shape_cast %64 : vector<2x16x1xi1> to vector<2x16x1xi1>
    %74 = vector.broadcast %73 : vector<2x16x1xi1> to vector<2x16x32xi1>
    %75 = vector.shape_cast %65 : vector<1x16x32xf32> to vector<1x16x32xf32>
    %76 = vector.broadcast %75 : vector<1x16x32xf32> to vector<2x16x32xf32>
    %77 = vector.broadcast %cst_48 : f32 to vector<2x16x32xf32>
    %78 = arith.select %74, %76, %77 : vector<2x16x32xi1>, vector<2x16x32xf32>
    %cst_49 = arith.constant dense<0xFF800000> : vector<2x32xf32>
    %79 = vector.multi_reduction <maximumf>, %78, %cst_49 [1] : vector<2x16x32xf32> to vector<2x32xf32>
    %c0_50 = arith.constant 0 : index
    %c0_51 = arith.constant 0 : index
    %80 = vector.load %arg15[%c0_50, %c0_51] : memref<96x32xf32, #tpu.memory_space<vmem>>, vector<32x32xf32>
    %cst_52 = arith.constant dense<0.000000e+00> : vector<2x32xf32>
    %81 = tpu.matmul %61, %80, %cst_52 {dimension_numbers = #tpu.dot_dimension_numbers<[1], [0], [0], [1], [0, 0, 1, 1], [], []>} : vector<2x32xf32>, vector<32x32xf32>, vector<2x32xf32> -> vector<2x32xf32>
    %c32 = arith.constant 32 : index
    %c0_53 = arith.constant 0 : index
    %82 = vector.load %arg15[%c32, %c0_53] : memref<96x32xf32, #tpu.memory_space<vmem>>, vector<32x32xf32>
    %cst_54 = arith.constant dense<0.000000e+00> : vector<2x32xf32>
    %83 = tpu.matmul %72, %82, %cst_54 {dimension_numbers = #tpu.dot_dimension_numbers<[1], [0], [0], [1], [0, 0, 1, 1], [], []>} : vector<2x32xf32>, vector<32x32xf32>, vector<2x32xf32> -> vector<2x32xf32>
    %84 = arith.addf %81, %83 : vector<2x32xf32>
    %c64 = arith.constant 64 : index
    %c0_55 = arith.constant 0 : index
    %85 = vector.load %arg15[%c64, %c0_55] : memref<96x32xf32, #tpu.memory_space<vmem>>, vector<32x32xf32>
    %cst_56 = arith.constant dense<0.000000e+00> : vector<2x32xf32>
    %86 = tpu.matmul %79, %85, %cst_56 {dimension_numbers = #tpu.dot_dimension_numbers<[1], [0], [0], [1], [0, 0, 1, 1], [], []>} : vector<2x32xf32>, vector<32x32xf32>, vector<2x32xf32> -> vector<2x32xf32>
    %87 = arith.addf %84, %86 : vector<2x32xf32>
    %c0_57 = arith.constant 0 : index
    %c0_58 = arith.constant 0 : index
    %88 = vector.load %arg16[%c0_57, %c0_58] : memref<1x32xf32, #tpu.memory_space<vmem>>, vector<1x32xf32>
    %89 = vector.broadcast %88 : vector<1x32xf32> to vector<2x32xf32>
    %90 = arith.addf %87, %89 : vector<2x32xf32>
    %cst_59 = arith.constant 0.000000e+00 : f32
    %91 = vector.broadcast %cst_59 : f32 to vector<2x32xf32>
    %92 = arith.maximumf %90, %91 : vector<2x32xf32>
    %c0_60 = arith.constant 0 : index
    %c0_61 = arith.constant 0 : index
    %93 = vector.load %arg17[%c0_60, %c0_61] : memref<1x32xf32, #tpu.memory_space<vmem>>, vector<1x32xf32>
    %c0_62 = arith.constant 0 : index
    %c0_63 = arith.constant 0 : index
    %94 = vector.load %arg18[%c0_62, %c0_63] : memref<1x32xf32, #tpu.memory_space<vmem>>, vector<1x32xf32>
    %cst_64 = arith.constant dense<0.000000e+00> : vector<2xf32>
    %95 = vector.multi_reduction <add>, %92, %cst_64 [1] : vector<2x32xf32> to vector<2xf32>
    %96 = vector.shape_cast %95 : vector<2xf32> to vector<2x1xf32>
    %cst_65 = arith.constant 3.200000e+01 : f32
    %97 = vector.broadcast %cst_65 : f32 to vector<2x1xf32>
    %98 = arith.divf %96, %97 : vector<2x1xf32>
    %99 = vector.broadcast %98 : vector<2x1xf32> to vector<2x32xf32>
    %100 = arith.subf %92, %99 : vector<2x32xf32>
    %101 = arith.mulf %100, %100 : vector<2x32xf32>
    %cst_66 = arith.constant dense<0.000000e+00> : vector<2xf32>
    %102 = vector.multi_reduction <add>, %101, %cst_66 [1] : vector<2x32xf32> to vector<2xf32>
    %103 = vector.shape_cast %102 : vector<2xf32> to vector<2x1xf32>
    %cst_67 = arith.constant 3.200000e+01 : f32
    %104 = vector.broadcast %cst_67 : f32 to vector<2x1xf32>
    %105 = arith.divf %103, %104 : vector<2x1xf32>
    %106 = vector.broadcast %98 : vector<2x1xf32> to vector<2x32xf32>
    %107 = arith.subf %92, %106 : vector<2x32xf32>
    %cst_68 = arith.constant 9.99999974E-6 : f32
    %108 = vector.broadcast %cst_68 : f32 to vector<2x1xf32>
    %109 = arith.addf %105, %108 : vector<2x1xf32>
    %110 = math.rsqrt %109 : vector<2x1xf32>
    %111 = vector.broadcast %110 : vector<2x1xf32> to vector<2x32xf32>
    %112 = arith.mulf %107, %111 : vector<2x32xf32>
    %113 = vector.broadcast %93 : vector<1x32xf32> to vector<2x32xf32>
    %114 = arith.mulf %112, %113 : vector<2x32xf32>
    %115 = vector.broadcast %94 : vector<1x32xf32> to vector<2x32xf32>
    %116 = arith.addf %114, %115 : vector<2x32xf32>
    %c0_69 = arith.constant 0 : index
    %c0_70 = arith.constant 0 : index
    %117 = vector.load %arg19[%c0_69, %c0_70] : memref<32x32xf32, #tpu.memory_space<vmem>>, vector<32x32xf32>
    %cst_71 = arith.constant dense<0.000000e+00> : vector<2x32xf32>
    %118 = tpu.matmul %116, %117, %cst_71 {dimension_numbers = #tpu.dot_dimension_numbers<[1], [0], [0], [1], [0, 0, 1, 1], [], []>} : vector<2x32xf32>, vector<32x32xf32>, vector<2x32xf32> -> vector<2x32xf32>
    %c0_72 = arith.constant 0 : index
    %c0_73 = arith.constant 0 : index
    %119 = vector.load %arg20[%c0_72, %c0_73] : memref<1x32xf32, #tpu.memory_space<vmem>>, vector<1x32xf32>
    %120 = vector.broadcast %119 : vector<1x32xf32> to vector<2x32xf32>
    %121 = arith.addf %118, %120 : vector<2x32xf32>
    %c0_74 = arith.constant 0 : index
    %c0_75 = arith.constant 0 : index
    %122 = vector.load %arg21[%c0_74, %c0_75] : memref<1x32xf32, #tpu.memory_space<vmem>>, vector<1x32xf32>
    %c0_76 = arith.constant 0 : index
    %c0_77 = arith.constant 0 : index
    %123 = vector.load %arg22[%c0_76, %c0_77] : memref<1x32xf32, #tpu.memory_space<vmem>>, vector<1x32xf32>
    %cst_78 = arith.constant dense<0.000000e+00> : vector<2xf32>
    %124 = vector.multi_reduction <add>, %121, %cst_78 [1] : vector<2x32xf32> to vector<2xf32>
    %125 = vector.shape_cast %124 : vector<2xf32> to vector<2x1xf32>
    %cst_79 = arith.constant 3.200000e+01 : f32
    %126 = vector.broadcast %cst_79 : f32 to vector<2x1xf32>
    %127 = arith.divf %125, %126 : vector<2x1xf32>
    %128 = vector.broadcast %127 : vector<2x1xf32> to vector<2x32xf32>
    %129 = arith.subf %121, %128 : vector<2x32xf32>
    %130 = arith.mulf %129, %129 : vector<2x32xf32>
    %cst_80 = arith.constant dense<0.000000e+00> : vector<2xf32>
    %131 = vector.multi_reduction <add>, %130, %cst_80 [1] : vector<2x32xf32> to vector<2xf32>
    %132 = vector.shape_cast %131 : vector<2xf32> to vector<2x1xf32>
    %cst_81 = arith.constant 3.200000e+01 : f32
    %133 = vector.broadcast %cst_81 : f32 to vector<2x1xf32>
    %134 = arith.divf %132, %133 : vector<2x1xf32>
    %135 = vector.broadcast %127 : vector<2x1xf32> to vector<2x32xf32>
    %136 = arith.subf %121, %135 : vector<2x32xf32>
    %cst_82 = arith.constant 9.99999974E-6 : f32
    %137 = vector.broadcast %cst_82 : f32 to vector<2x1xf32>
    %138 = arith.addf %134, %137 : vector<2x1xf32>
    %139 = math.rsqrt %138 : vector<2x1xf32>
    %140 = vector.broadcast %139 : vector<2x1xf32> to vector<2x32xf32>
    %141 = arith.mulf %136, %140 : vector<2x32xf32>
    %142 = vector.broadcast %122 : vector<1x32xf32> to vector<2x32xf32>
    %143 = arith.mulf %141, %142 : vector<2x32xf32>
    %144 = vector.broadcast %123 : vector<1x32xf32> to vector<2x32xf32>
    %145 = arith.addf %143, %144 : vector<2x32xf32>
    %cst_83 = arith.constant 0.000000e+00 : f32
    %146 = vector.broadcast %cst_83 : f32 to vector<2x32xf32>
    %147 = arith.maximumf %145, %146 : vector<2x32xf32>
    %c0_84 = arith.constant 0 : index
    %c0_85 = arith.constant 0 : index
    %148 = vector.load %arg23[%c0_84, %c0_85] : memref<32x1xf32, #tpu.memory_space<vmem>>, vector<32x1xf32>
    %cst_86 = arith.constant dense<0.000000e+00> : vector<2x1xf32>
    %149 = tpu.matmul %147, %148, %cst_86 {dimension_numbers = #tpu.dot_dimension_numbers<[1], [0], [0], [1], [0, 0, 1, 1], [], []>} : vector<2x32xf32>, vector<32x1xf32>, vector<2x1xf32> -> vector<2x1xf32>
    %c0_87 = arith.constant 0 : index
    %c0_88 = arith.constant 0 : index
    %150 = vector.load %arg24[%c0_87, %c0_88] : memref<1x1xf32, #tpu.memory_space<vmem>>, vector<1x1xf32>
    %151 = vector.broadcast %150 : vector<1x1xf32> to vector<2x1xf32>
    %152 = arith.addf %149, %151 : vector<2x1xf32>
    %c0_89 = arith.constant 0 : index
    %c0_90 = arith.constant 0 : index
    %153 = vector.load %arg26[%c0_89, %c0_90] : memref<2x1xf32, #tpu.memory_space<vmem>>, vector<2x1xf32>
    tpu.vector_store %arg26[%c0_89, %c0_90], %152 {strides = array<i32>} : memref<2x1xf32, #tpu.memory_space<vmem>>, vector<2x1xf32>,
    %c0_91 = arith.constant 0 : index
    %c0_92 = arith.constant 0 : index
    %154 = vector.load %arg25[%c0_91, %c0_92] : memref<2x1xf32, #tpu.memory_space<vmem>>, vector<2x1xf32>
    %cst_93 = arith.constant 0.000000e+00 : f32
    %155 = vector.broadcast %cst_93 : f32 to vector<2x1xf32>
    %156 = arith.maximumf %152, %155 : vector<2x1xf32>
    %157 = arith.mulf %152, %154 : vector<2x1xf32>
    %158 = arith.subf %156, %157 : vector<2x1xf32>
    %159 = math.absf %152 : vector<2x1xf32>
    %cst_94 = arith.constant 0.000000e+00 : f32
    %160 = vector.broadcast %cst_94 : f32 to vector<2x1xf32>
    %161 = arith.subf %160, %159 : vector<2x1xf32>
    %162 = math.exp %161 : vector<2x1xf32>
    %cst_95 = arith.constant 1.000000e+00 : f32
    %163 = vector.broadcast %cst_95 : f32 to vector<2x1xf32>
    %164 = arith.addf %163, %162 : vector<2x1xf32>
    %165 = math.log %164 : vector<2x1xf32>
    %166 = arith.addf %158, %165 : vector<2x1xf32>
    %167 = vector.shape_cast %166 : vector<2x1xf32> to vector<1x2x1xf32>
    %cst_96 = arith.constant dense<0.000000e+00> : vector<1xf32>
    %168 = vector.multi_reduction <add>, %167, %cst_96 [1, 2] : vector<1x2x1xf32> to vector<1xf32>
    %169 = vector.shape_cast %168 : vector<1xf32> to vector<1x1x1xf32>
    %170 = vector.extract %169[0, 0, 0] : f32 from vector<1x1x1xf32>
    %171 = vector.broadcast %170 : f32 to vector<1x1xf32>
    %cst_97 = arith.constant 2.000000e+00 : f32
    %172 = vector.broadcast %cst_97 : f32 to vector<1x1xf32>
    %173 = arith.divf %171, %172 : vector<1x1xf32>
    %c0_98 = arith.constant 0 : index
    %c0_99 = arith.constant 0 : index
    %174 = vector.load %arg27[%c0_98, %c0_99] : memref<1x1xf32, #tpu.memory_space<vmem>>, vector<1x1xf32>
    tpu.vector_store %arg27[%c0_98, %c0_99], %173 {strides = array<i32>} : memref<1x1xf32, #tpu.memory_space<vmem>>, vector<1x1xf32>,
    return
  }
}

</mosaic_0001>

<bundles_post_ra>
// kernel: tpu_custom_call.1
= control target key start
LH: loop header
LB: loop body
LE: loop exit
PB: predicated region body
PF: predicated region fallthrough
CT: control target
= control target key end

     0   :  { %s2025_s0 = inlined_call_operand.vmem [shape: bf16[16,16], index: 0, kind: input, shape index: {}]   ;;  %s2026_s1 = inlined_call_operand.vmem [shape: f32[16,8], index: 1, kind: input, shape index: {}]   ;;  %s2027_s2 = inlined_call_operand.vmem [shape: bf16[8,32], index: 2, kind: input, shape index: {}]   ;;  %s2028_s3 = inlined_call_operand.vmem [shape: f32[1,32], index: 3, kind: input, shape index: {}]   ;;  %s2029_s4 = inlined_call_operand.vmem [shape: bf16[32,32], index: 4, kind: input, shape index: {}]   ;;  %s2030_s5 = inlined_call_operand.vmem [shape: f32[1,32], index: 5, kind: input, shape index: {}]   ;;  %s2031_s6 = inlined_call_operand.vmem [shape: bf16[32,32], index: 6, kind: input, shape index: {}]   ;;  %s2032_s7 = inlined_call_operand.vmem [shape: f32[1,32], index: 7, kind: input, shape index: {}]   ;;  %s2033_s8 = inlined_call_operand.vmem [shape: bf16[32,32], index: 8, kind: input, shape index: {}]   ;;  %s2034_s9 = inlined_call_operand.vmem [shape: f32[1,32], index: 9, kind: input, shape index: {}]   ;;  %s2035_s10 = inlined_call_operand.vmem [shape: bf16[32,32], index: 10, kind: input, shape index: {}]   ;;  %s2036_s11 = inlined_call_operand.vmem [shape: f32[1,32], index: 11, kind: input, shape index: {}]   ;;  %s2037_s12 = inlined_call_operand.vmem [shape: bf16[32,32], index: 12, kind: input, shape index: {}]   ;;  %s2038_s13 = inlined_call_operand.vmem [shape: f32[1,32], index: 13, kind: input, shape index: {}]   ;;  %s2039_s14 = inlined_call_operand.vmem [shape: f32[2,16], index: 14, kind: input, shape index: {}]   ;;  %s2040_s15 = inlined_call_operand.vmem [shape: f32[96,32], index: 15, kind: input, shape index: {}]   ;;  %s2041_s16 = inlined_call_operand.vmem [shape: f32[1,32], index: 16, kind: input, shape index: {}]   ;;  %s2042_s17 = inlined_call_operand.vmem [shape: f32[1,32], index: 17, kind: input, shape index: {}]   ;;  %s2043_s18 = inlined_call_operand.vmem [shape: f32[1,32], index: 18, kind: input, shape index: {}]   ;;  %s2044_s19 = inlined_call_operand.vmem [shape: f32[32,32], index: 19, kind: input, shape index: {}]   ;;  %s2045_s20 = inlined_call_operand.vmem [shape: f32[1,32], index: 20, kind: input, shape index: {}]   ;;  %s2046_s21 = inlined_call_operand.vmem [shape: f32[1,32], index: 21, kind: input, shape index: {}]   ;;  %s2047_s22 = inlined_call_operand.vmem [shape: f32[1,32], index: 22, kind: input, shape index: {}]   ;;  %s2048_s23 = inlined_call_operand.vmem [shape: f32[32,1], index: 23, kind: input, shape index: {}]   ;;  %s2049_s24 = inlined_call_operand.<no memory space> [shape: f32[1,1], index: 24, kind: input, shape index: {}]   ;;  %s2050_s25 = inlined_call_operand.vmem [shape: f32[2,1], index: 25, kind: input, shape index: {}]   ;;  %s2051_s26 = inlined_call_operand.vmem [shape: f32[2,1], index: 26, kind: output, shape index: {0}]   ;;  %s2052_s27 = inlined_call_operand.hbm [shape: f32[1,1], index: 27, kind: output, shape index: {1}]  }
   0x1   :  { %2058 = sst [smem:[#allocation6_spill]] %s2025_s0  ;;  %v33_v0 = vstv %s2049_s24 }
   0x2   :  { %2059 = sst [smem:[#allocation7_spill]] %s2026_s1  ;;  %34 = vst [vmem:[#allocation2] sm:$0x1] %v33_v0 }
   0x3   :  { %2060 = sst [smem:[#allocation8_spill]] %s2027_s2 }
   0x4   :  { %2061 = sst [smem:[#allocation9_spill]] %s2028_s3 }
   0x5   :  { %2062 = sst [smem:[#allocation10_spill]] %s2029_s4 }
   0x6   :  { %2063 = sst [smem:[#allocation11_spill]] %s2030_s5 }
   0x7   :  { %2064 = sst [smem:[#allocation12_spill]] %s2031_s6 }
   0x8   :  { %2065 = sst [smem:[#allocation13_spill]] %s2032_s7 }
   0x9   :  { %2066 = sst [smem:[#allocation14_spill]] %s2033_s8 }
   0xa   :  { %2067 = sst [smem:[#allocation15_spill]] %s2034_s9 }
   0xb   :  { %2068 = sst [smem:[#allocation16_spill]] %s2035_s10 }
   0xc   :  { %2069 = sst [smem:[#allocation17_spill]] %s2036_s11 }
   0xd   :  { %s2070_s9 = sld [smem:[#allocation7_spill]]  ;;  %v1618_v3 = vmov 0.0   ;;  %vm1619_vm0 = vmmov 0   ;;  %s2071_s24 = sld [smem:[#allocation6_spill]]  ;;  %vm106_vm1 = vcmask 130048  }
   0xe   :  { %1408 = vmatprep.subr.bf16.mxu0 %v1618_v3  ;;  %1410 = vmatprep.mubr.msk.bf16.mxu0 %vm1619_vm0, %v1618_v3 }
   0xf   :  { %1414 = vmatprep.subr.bf16.mxu1 %v1618_v3  ;;  %1416 = vmatprep.mubr.msk.bf16.mxu1 %vm1619_vm0, %v1618_v3 }
  0x13   :  { %v91_v1 = vld [vmem:[%s2070_s9] sm:$0xff]  ;;  %v92_v2 = vld [vmem:[%s2070_s9 + $0x8] sm:$0xff] }
  0x14   :  { %v100_v4 = vpack.c.bf16 %v92_v2, %v91_v1  ;;  %v1777_v5 = vld [vmem:[%s2071_s24] sm:$0xff]  }
  0x16   :  { %1409 = vmatpush3.bf16.msra.mxu0 %v100_v4 }
  0x17   :  { %1420 = vmatprep.subr.bf16.mxu0 %v1618_v3 }
  0x19   :  { %1411 = vmatmul.mubr.msk.bf16.vlgmr.msra.gmra.mrb[0].mxu0 %vm106_vm1, %v1777_v5 }
  0x1a   :  { %1424 = vmatprep.mubr.msk.bf16.mxu0 %vm1619_vm0, %v1618_v3 }
  0x1b   :  { %35 = vsyncpa [#allocation4], 0  ;;  %s2072_s6 = sld [smem:[#allocation8_spill]]  ;;  %vm162_vm2 = vcmask 1043456   ;;  %vm158_vm3 = vcmask 64512   ;;  %s2073_s3 = sld [smem:[#allocation10_spill]] }
  0x1c   :  { %s2074_s9 = sld [smem:[#allocation9_spill]]  ;;  %vm228_vm4 = vcmask 261120   ;;  %s2075_s0 = sld [smem:[#allocation12_spill]]  ;;  %vm638_vm5 = vcmask 123904   ;;  %vm806_vm10 = vcmask 1041409   ;;  %vm1044_vm11 = vcmask 254976  }
  0x1d   :  { %s2076_s29 = sld [smem:[#allocation11_spill]]  ;;  %vm1271_vm12 = vcmask 1024   ;;  %vm1298_vm13 = vcmask 0  }
  0x21   :  { %v93_v6 = vld [vmem:[%s2072_s6] sm:$0xf]  ;;  %v1575_v14 = vld [vmem:[%s2073_s3 + $0x8] sm:$0xff]  }
  0x22   :  { %v164_v7 = vsel %vm162_vm2, %v93_v6, 0  ;;  %v1574_v13 = vld [vmem:[%s2073_s3] sm:$0xff]   ;;  %v1577_v36 = vld [vmem:[%s2075_s0 + $0x8] sm:$0xff]   ;;  %s2077_s3 = sld [smem:[#allocation14_spill]] }
  0x23   :  { %1415 = vmatpush3.bf16.msra.mxu1 %v164_v7  ;;  %1421 = vmatpush3.bf16.msra.mxu0 %v1574_v13  ;;  %v1320_v15 = vld [vmem:[%s2074_s9] ss:$0 sm:$0xff]  ;;  %s2078_s9 = sld [smem:[#allocation13_spill]] }
  0x24   :  { %1428 = vmatprep.subr.bf16.mxu1 %v1618_v3  ;;  %1422 = vmatprep.subr.bf16.mxu0 %v1618_v3  ;;  %v1576_v25 = vld [vmem:[%s2075_s0] sm:$0xff]   ;;  %s2079_s0 = sld [smem:[#allocation16_spill]] }
  0x25   :  { %v1322_v26 = vld [vmem:[%s2076_s29] ss:$0 sm:$0xff]  ;;  %s2080_s29 = sld [smem:[#allocation15_spill]] }
  0x27   :  { %1423 = vmatpush3.bf16.msra.mxu0 %v1575_v14 }
  0x28   :  { %1434 = vmatprep.subr.bf16.mxu0 %v1618_v3  ;;  %v1578_v42 = vld [vmem:[%s2077_s3] sm:$0xff]   ;;  %v1579_v43 = vld [vmem:[%s2077_s3 + $0x8] sm:$0xff]  }
  0x29   :  { %v1327_v44 = vld [vmem:[%s2078_s9] ss:$0 sm:$0xff] }
  0x2a   :  { %v1580_v54 = vld [vmem:[%s2079_s0] sm:$0xff]   ;;  %v1581_v1 = vld [vmem:[%s2079_s0 + $0x8] sm:$0xff]  }
  0x2b   :  { %v1331_v55 = vld [vmem:[%s2080_s29] ss:$0 sm:$0xff] }
  0xec   :  { %v144_v8 = vpop.f32.mrb[0].mxu0 }
  0xed   :  { %v1412_v9 = vpop.f32.mrb[1].mxu0 }
  0xee   :  { %v147_v10 = vpop.f32.mrb[2].mxu0  ;;  %v1583_v9 = vld [vmem:[%s2037_s12 + $0x8] sm:$0xff]  }
  0xef   :  { %v151_v11 = vpack.c.bf16 %v147_v10, %v144_v8  ;;  %v1413_v12 = vpop.f32.mrb[3].mxu0  ;;  %v1868_v10 = vld [vmem:[%s2039_s14] sm:$0x3]  ;;  %s2081_s14 = sld [smem:[#allocation17_spill]] }
  0xf0   :  { %v639_v12 = vsel %vm638_vm5, %v1868_v10, 0.0 }
  0xf1   :  { %1417 = vmatmul.mubr.msk.bf16.vlgmr.msra.gmra.mrb[0].mxu1 %vm158_vm3, %v151_v11  ;;  %v718_v11 = vlaneseq  ;;  %640 = vadd.xlane.f32.xlu0 %v639_v12 }
  0xf2   :  { %1430 = vmatprep.mubr.msk.bf16.mxu1 %vm1619_vm0, %v1618_v3 }
  0xf3   :  { %v719_v13 = vshrl.u32 %v718_v11, 7 }
  0xf5   :  { %v720_v14 = vsub.s32 0, %v719_v13 }
 0x1c4   :  { %v200_v16 = vpop.f32.mrb[0].mxu1 }
 0x1c5   :  { %v201_v17 = vadd.f32 %v1320_v15, %v200_v16  ;;  %v1418_v18 = vpop.f32.mrb[1].mxu1  ;;  %v721_v16 = vrot.slane %v1868_v10, %v720_v14 }
 0x1c6   :  { %v203_v19 = vpop.f32.mrb[2].mxu1  ;;  %v1336_v18 = vld [vmem:[%s2081_s14] ss:$0 sm:$0xff] }
 0x1c7   :  { %v204_v20 = vadd.f32 %v1320_v15, %v203_v19  ;;  %v1419_v21 = vpop.f32.mrb[3].mxu1  ;;  %v207_v22 = vmax.f32 %v201_v17, 0.0  ;;  %v731_v15 = vsub.s32 1, %v719_v13  ;;  %727 = vbcast.lane.b32.xlu1 %v721_v16, 264  ;;  %723 = vbcast.lane.b32.xlu0 %v721_v16, 256 }
 0x1c9   :  { %v208_v23 = vmax.f32 %v204_v20, 0.0  ;;  %v732_v17 = vrot.slane %v1868_v10, %v731_v15 }
 0x1cb   :  { %v209_v24 = vpack.c.bf16 %v208_v23, %v207_v22  ;;  %734 = vbcast.lane.b32.xlu1 %v732_v17, 256 }
 0x1cd   :  { %1425 = vmatmul.mubr.msk.bf16.vlgmr.msra.gmra.mrb[4].mxu0 %vm228_vm4, %v209_v24 }
 0x1ce   :  { %1438 = vmatprep.mubr.msk.bf16.mxu0 %vm1619_vm0, %v1618_v3  ;;  %1435 = vmatpush3.bf16.msra.mxu0 %v1576_v25 }
 0x1cf   :  { %1436 = vmatprep.subr.bf16.mxu0 %v1618_v3  ;;  %738 = vbcast.lane.b32.xlu1 %v732_v17, 264 }
 0x1d2   :  { %1437 = vmatpush3.bf16.msra.mxu0 %v1577_v36  ;;  %v1895_v36 = vpop.xlane.xlu0 %640 }
 0x1d3   :  { %1450 = vmatprep.subr.bf16.mxu0 %v1618_v3 }
 0x2a0   :  { %v266_v27 = vpop.f32.mrb[4].mxu0 }
 0x2a1   :  { %v267_v28 = vadd.f32 %v1322_v26, %v266_v27  ;;  %v1426_v29 = vpop.f32.mrb[5].mxu0 }
 0x2a2   :  { %v269_v30 = vpop.f32.mrb[6].mxu0  ;;  %v800_v29 = vld [vmem:[%s2040_s15 + $0x20] sm:$0xff] }
 0x2a3   :  { %v270_v31 = vadd.f32 %v1322_v26, %v269_v30  ;;  %v1427_v32 = vpop.f32.mrb[7].mxu0  ;;  %v273_v33 = vmax.f32 %v267_v28, 0.0  ;;  %v1620_v28 = vmov 0.0|0.0   ;;  %v801_v30 = vld [vmem:[%s2040_s15 + $0x28] sm:$0xff] }
 0x2a4   :  { %v802_v32 = vld [vmem:[%s2040_s15 + $0x30] sm:$0xff] }
 0x2a5   :  { %v274_v34 = vmax.f32 %v270_v31, 0.0  ;;  %v1538_v31 = vpack.c.bf16 %v801_v30, %v800_v29 }
 0x2a7   :  { %v285_v35 = vpack.c.bf16 %v274_v34, %v273_v33  ;;  %v803_v33 = vld [vmem:[%s2040_s15 + $0x38] sm:$0xff] }
 0x2a8   :  { %v1541_v34 = vpack.c.bf16 %v803_v33, %v802_v32 }
 0x2a9   :  { %1429 = vmatpush3.bf16.msra.mxu1 %v285_v35  ;;  %v728_v35 = vpop.permute.xlu1 %727 }
 0x2aa   :  { %1442 = vmatprep.subr.bf16.mxu1 %v1618_v3  ;;  %vm741_vm8 = vcmp.gt.f32.partialorder %v728_v35, 0.5  ;;  %v955_v35 = vld [vmem:[%s2040_s15 + $0x50] sm:$0xff] }
 0x2ac   :  { %1431 = vmatmul.mubr.msk.bf16.vlgmr.msra.gmra.mrb[4].mxu1 %vm106_vm1, %v1777_v5 }
 0x2ad   :  { %1446 = vmatprep.mubr.msk.bf16.mxu1 %vm1619_vm0, %v1618_v3  ;;  %1443 = vmatpush3.bf16.msra.mxu1 %v1578_v42 }
 0x2ae   :  { %1444 = vmatprep.subr.bf16.mxu1 %v1618_v3 }
 0x2b1   :  { %1445 = vmatpush3.bf16.msra.mxu1 %v1579_v43 }
 0x2b2   :  { %1456 = vmatprep.subr.bf16.mxu1 %v1618_v3 }
 0x37f   :  { %v320_v37 = vpop.f32.mrb[4].mxu1 }
 0x380   :  { %v1432_v38 = vpop.f32.mrb[5].mxu1 }
 0x381   :  { %v323_v39 = vpop.f32.mrb[6].mxu1  ;;  %v724_v38 = vpop.permute.xlu0 %723 }
 0x382   :  { %v327_v40 = vpack.c.bf16 %v323_v39, %v320_v37  ;;  %v1433_v41 = vpop.f32.mrb[7].mxu1  ;;  %v735_v37 = vpop.permute.xlu1 %734  ;;  %v1340_v39 = vld [vmem:[%s2038_s13] ss:$0 sm:$0xff]  ;;  %vm740_vm7 = vcmp.gt.f32.partialorder %v724_v38, 0.5 }
 0x383   :  { %vm742_vm6 = vcmp.gt.f32.partialorder %v735_v37, 0.5  ;;  %v956_v37 = vld [vmem:[%s2040_s15 + $0x58] sm:$0xff] }
 0x384   :  { %1439 = vmatmul.mubr.msk.bf16.vlgmr.msra.gmra.mrb[8].mxu0 %vm228_vm4, %v327_v40 }
 0x385   :  { %1452 = vmatprep.mubr.msk.bf16.mxu0 %vm1619_vm0, %v1618_v3 }
 0x386   :  { %v739_v40 = vpop.permute.xlu1 %738 }
 0x387   :  { %vm743_vm9 = vcmp.gt.f32.partialorder %v739_v40, 0.5  ;;  %v1553_v40 = vpack.c.bf16 %v956_v37, %v955_v35 }
 0x457   :  { %v383_v45 = vpop.f32.mrb[8].mxu0 }
 0x458   :  { %v384_v46 = vadd.f32 %v1327_v44, %v383_v45  ;;  %v1440_v47 = vpop.f32.mrb[9].mxu0  ;;  %v796_v45 = vld [vmem:[%s2040_s15] sm:$0xff] }
 0x459   :  { %v386_v48 = vpop.f32.mrb[10].mxu0 }
 0x45a   :  { %v387_v49 = vadd.f32 %v1327_v44, %v386_v48  ;;  %v1441_v50 = vpop.f32.mrb[11].mxu0  ;;  %v390_v51 = vmax.f32 %v384_v46, 0.0  ;;  %v797_v46 = vld [vmem:[%s2040_s15 + $0x8] sm:$0xff] }
 0x45c   :  { %v391_v52 = vmax.f32 %v387_v49, 0.0 }
 0x45e   :  { %v392_v53 = vpack.c.bf16 %v391_v52, %v390_v51 }
 0x460   :  { %1447 = vmatmul.mubr.msk.bf16.vlgmr.msra.gmra.mrb[8].mxu1 %vm228_vm4, %v392_v53 }
 0x461   :  { %1460 = vmatprep.mubr.msk.bf16.mxu1 %vm1619_vm0, %v1618_v3  ;;  %1457 = vmatpush3.bf16.msra.mxu1 %v1580_v54 }
 0x462   :  { %1458 = vmatprep.subr.bf16.mxu1 %v1618_v3 }
 0x465   :  { %1459 = vmatpush3.bf16.msra.mxu1 %v1581_v1 }
 0x466   :  { %1534 = vmatprep.subr.bf16.mxu1 %v1620_v28 }
 0x533   :  { %v448_v56 = vpop.f32.mrb[8].mxu1 }
 0x534   :  { %v449_v57 = vadd.f32 %v1331_v55, %v448_v56  ;;  %v1448_v58 = vpop.f32.mrb[9].mxu1 }
 0x535   :  { %v451_v59 = vpop.f32.mrb[10].mxu1 }
 0x536   :  { %v452_v60 = vadd.f32 %v1331_v55, %v451_v59  ;;  %v1449_v61 = vpop.f32.mrb[11].mxu1  ;;  %v455_v62 = vmax.f32 %v449_v57, 0.0 }
 0x538   :  { %v456_v63 = vmax.f32 %v452_v60, 0.0 }
 0x53a   :  { %v467_v0 = vpack.c.bf16 %v456_v63, %v455_v62 }
 0x53c   :  { %1451 = vmatpush3.bf16.msra.mxu0 %v467_v0 }
 0x53d   :  { %1464 = vmatprep.subr.bf16.mxu0 %v1618_v3 }
 0x53f   :  { %1453 = vmatmul.mubr.msk.bf16.vlgmr.msra.gmra.mrb[12].mxu0 %vm106_vm1, %v1777_v5  ;;  %v1582_v5 = vld [vmem:[%s2037_s12] sm:$0xff]  }
 0x540   :  { %1468 = vmatprep.mubr.msk.bf16.mxu0 %vm1619_vm0, %v1618_v3  ;;  %1465 = vmatpush3.bf16.msra.mxu0 %v1582_v5 }
 0x541   :  { %1466 = vmatprep.subr.bf16.mxu0 %v1618_v3 }
 0x544   :  { %1467 = vmatpush3.bf16.msra.mxu0 %v1583_v9 }
 0x545   :  { %1537 = vmatprep.subr.bf16.mxu0 %v1620_v28 }
 0x612   :  { %v502_v2 = vpop.f32.mrb[12].mxu0 }
 0x613   :  { %v1454_v4 = vpop.f32.mrb[13].mxu0 }
 0x614   :  { %v505_v6 = vpop.f32.mrb[14].mxu0  ;;  %v1544_v4 = vpack.c.bf16 %v797_v46, %v796_v45  ;;  %v642_v45 = vmax.f32 %v1895_v36, 1.0  ;;  %v1348_v36 = vld [vmem:[%s2041_s16] ss:$0 sm:$0xff] }
 0x615   :  { %v509_v7 = vpack.c.bf16 %v505_v6, %v502_v2  ;;  %v1455_v8 = vpop.f32.mrb[15].mxu0 }
 0x616   :  { %1584 = vrcp.f32 %v642_v45 }
 0x617   :  { %1461 = vmatmul.mubr.msk.bf16.vlgmr.msra.gmra.mrb[12].mxu1 %vm228_vm4, %v509_v7 }
 0x618   :  { %1476 = vmatprep.mubr.msk.f32.mxu1 %vm1619_vm0, %v1618_v3 }
 0x620   :  { %v1585_v46 = vpop.eup %1584 }
 0x6ea   :  { %v565_v19 = vpop.f32.mrb[12].mxu1 }
 0x6eb   :  { %v566_v20 = vadd.f32 %v1336_v18, %v565_v19  ;;  %v1462_v21 = vpop.f32.mrb[13].mxu1 }
 0x6ec   :  { %v568_v22 = vpop.f32.mrb[14].mxu1 }
 0x6ed   :  { %v569_v23 = vadd.f32 %v1336_v18, %v568_v22  ;;  %v1463_v24 = vpop.f32.mrb[15].mxu1  ;;  %v572_v25 = vmax.f32 %v566_v20, 0.0 }
 0x6ef   :  { %v573_v26 = vmax.f32 %v569_v23, 0.0  ;;  %v954_v23 = vld [vmem:[%s2040_s15 + $0x48] sm:$0xff] }
 0x6f1   :  { %v574_v27 = vpack.c.bf16 %v573_v26, %v572_v25 }
 0x6f3   :  { %1469 = vmatmul.mubr.msk.bf16.vlgmr.msra.gmra.mrb[16].mxu0 %vm228_vm4, %v574_v27 }
 0x6f4   :  { %1487 = vmatprep.mubr.msk.f32.mxu0 %vm1619_vm0, %v1618_v3  ;;  %1539 = vmatpush3.bf16.msra.mxu0 %v1538_v31 }
 0x6f5   :  { %1540 = vmatprep.subr.bf16.mxu0 %v1620_v28 }
 0x6f8   :  { %1542 = vmatpush3.bf16.msra.mxu0 %v1541_v34 }
 0x6f9   :  { %1549 = vmatprep.subr.bf16.mxu0 %v1620_v28 }
 0x7c6   :  { %v630_v41 = vpop.f32.mrb[16].mxu0 }
 0x7c7   :  { %v631_v42 = vadd.f32 %v1340_v39, %v630_v41  ;;  %v1470_v43 = vpop.f32.mrb[17].mxu0 }
 0x7c8   :  { %v633_v44 = vpop.f32.mrb[18].mxu0  ;;  %v799_v43 = vld [vmem:[%s2040_s15 + $0x18] sm:$0xff] }
 0x7c9   :  { %v752_v47 = vsel %vm740_vm7, %v631_v42, 3e+38  ;;  %v774_v48 = vsel %vm740_vm7, %v631_v42, -3e+38  ;;  %v634_v49 = vadd.f32 %v1340_v39, %v633_v44  ;;  %v754_v50 = vsel %vm742_vm6, %v631_v42, 3e+38 }
 0x7ca   :  { %v756_v51 = vsel %vm228_vm4, %v752_v47, inf  ;;  %v778_v52 = vsel %vm228_vm4, %v774_v48, -inf  ;;  %v765_v53 = vsel %vm228_vm4, %v754_v50, inf  ;;  %v776_v54 = vsel %vm742_vm6, %v631_v42, -3e+38  ;;  %v1471_v55 = vpop.f32.mrb[19].mxu0 }
 0x7cb   :  { %v753_v56 = vsel %vm741_vm8, %v634_v49, 3e+38  ;;  %v775_v57 = vsel %vm741_vm8, %v634_v49, -3e+38  ;;  %v755_v58 = vsel %vm743_vm9, %v634_v49, 3e+38  ;;  %v1535_v59 = vpack.c.bf16 %v634_v49, %v631_v42 }
 0x7cc   :  { %v757_v60 = vsel %vm228_vm4, %v753_v56, inf  ;;  %v779_v61 = vsel %vm228_vm4, %v775_v57, -inf  ;;  %v766_v62 = vsel %vm228_vm4, %v755_v58, inf  ;;  %v777_v63 = vsel %vm743_vm9, %v634_v49, -3e+38  ;;  %v798_v42 = vld [vmem:[%s2040_s15 + $0x10] sm:$0xff] }
 0x7cd   :  { %v758_v0 = vmin.f32 %v756_v51, %v757_v60  ;;  %v780_v1 = vmax.f32 %v778_v52, %v779_v61  ;;  %v767_v2 = vmin.f32 %v765_v53, %v766_v62  ;;  %1536 = vmatpush3.bf16.msra.mxu1 %v1535_v59  ;;  %v787_v6 = vsel %vm228_vm4, %v776_v54, -inf }
 0x7ce   :  { %v788_v7 = vsel %vm228_vm4, %v777_v63, -inf  ;;  %1543 = vmatprep.subr.bf16.mxu1 %v1620_v28  ;;  %v1547_v44 = vpack.c.bf16 %v799_v43, %v798_v42 }
 0x7cf   :  { %v768_v8 = vrot.slane %v767_v2, 4  ;;  %v789_v5 = vmax.f32 %v787_v6, %v788_v7  ;;  %v759_v9 = vrot.slane %v758_v0, 4  ;;  %v781_v11 = vrot.slane %v780_v1, 4  ;;  %v1075_v6 = vld [vmem:[%s2044_s19 + $0x10] sm:$0xff]  ;;  %v1076_v7 = vld [vmem:[%s2044_s19 + $0x18] sm:$0xff] }
 0x7d0   :  { %1477 = vmatmul.mubr.msk.f32.vlgmr.msra.gmra.mrb[16].mxu1 %vm106_vm1, %v1868_v10  ;;  %v953_v10 = vld [vmem:[%s2040_s15 + $0x40] sm:$0xff] }
 0x7d1   :  { %v769_v12 = vmin.f32 %v767_v2, %v768_v8  ;;  %v790_v13 = vrot.slane %v789_v5, 4  ;;  %v760_v14 = vmin.f32 %v758_v0, %v759_v9  ;;  %v782_v15 = vmax.f32 %v780_v1, %v781_v11  ;;  %1545 = vmatpush3.bf16.msra.mxu1 %v1544_v4  ;;  %1498 = vmatprep.mubr.msk.f32.mxu1 %vm1619_vm0, %v1618_v3  ;;  %v1073_v1 = vld [vmem:[%s2044_s19] sm:$0xff]  ;;  %v1074_v2 = vld [vmem:[%s2044_s19 + $0x8] sm:$0xff] }
 0x7d2   :  { %1546 = vmatprep.subr.bf16.mxu1 %v1620_v28  ;;  %v1550_v30 = vpack.c.bf16 %v954_v23, %v953_v10  ;;  %v1556_v4 = vpack.c.bf16 %v1074_v2, %v1073_v1  ;;  %v1559_v8 = vpack.c.bf16 %v1076_v7, %v1075_v6 }
 0x7d3   :  { %v770_v16 = vrot.slane %v769_v12, 2  ;;  %v791_v17 = vmax.f32 %v789_v5, %v790_v13  ;;  %v761_v18 = vrot.slane %v760_v14, 2  ;;  %v783_v19 = vrot.slane %v782_v15, 2  ;;  %v1349_v13 = vld [vmem:[%s2042_s17] ss:$0 sm:$0xff] }
 0x7d5   :  { %v771_v20 = vmin.f32 %v769_v12, %v770_v16  ;;  %v792_v21 = vrot.slane %v791_v17, 2  ;;  %v762_v22 = vmin.f32 %v760_v14, %v761_v18  ;;  %v784_v24 = vmax.f32 %v782_v15, %v783_v19  ;;  %1548 = vmatpush3.bf16.msra.mxu1 %v1547_v44  ;;  %v1350_v15 = vld [vmem:[%s2043_s18] ss:$0 sm:$0xff] }
 0x7d6   :  { %1555 = vmatprep.subr.bf16.mxu1 %v1620_v28  ;;  %v1351_v18 = vld [vmem:[%s2045_s20] ss:$0 sm:$0xff] }
 0x7d7   :  { %v772_v25 = vrot.slane %v771_v20, 1  ;;  %v793_v26 = vmax.f32 %v791_v17, %v792_v21  ;;  %v763_v27 = vrot.slane %v762_v22, 1  ;;  %v785_v29 = vrot.slane %v784_v24, 1 }
 0x7d9   :  { %v773_v31 = vmin.f32 %v771_v20, %v772_v25  ;;  %v794_v32 = vrot.slane %v793_v26, 1  ;;  %v764_v33 = vmin.f32 %v762_v22, %v763_v27  ;;  %v786_v34 = vmax.f32 %v784_v24, %v785_v29  ;;  %v1187_v27 = vld [vmem:[%s2048_s23] sm:$0xff]  ;;  %v1188_v29 = vld [vmem:[%s2048_s23 + $0x8] sm:$0xff] }
 0x7db   :  { %v795_v38 = vmax.f32 %v793_v26, %v794_v32  ;;  %v807_v39 = vsel %vm806_vm10, %v773_v31, %v764_v33  ;;  %v1562_v31 = vpack.c.bf16 %v1188_v29, %v1187_v27  ;;  %v1190_v32 = vld [vmem:[%s2048_s23 + $0x18] sm:$0xff] }
 0x7dc   :  { %1488 = vmatmul.mubr.msk.f32.vlgmr.msra.gmra.mrb[20].mxu0 %vm228_vm4, %v807_v39  ;;  %v1353_v39 = vld [vmem:[%s2046_s21] ss:$0 sm:$0xff] }
 0x7dd   :  { %1551 = vmatpush3.bf16.msra.mxu0 %v1550_v30  ;;  %1509 = vmatprep.mubr.msk.f32.mxu0 %vm1619_vm0, %v1618_v3  ;;  %v959_v41 = vsel %vm806_vm10, %v795_v38, %v786_v34  ;;  %v1189_v30 = vld [vmem:[%s2048_s23 + $0x10] sm:$0xff] }
 0x7de   :  { %1552 = vmatprep.subr.bf16.mxu0 %v1620_v28  ;;  %v1565_v33 = vpack.c.bf16 %v1190_v32, %v1189_v30 }
 0x7e1   :  { %1554 = vmatpush3.bf16.msra.mxu0 %v1553_v40 }
 0x7e2   :  { %1561 = vmatprep.subr.bf16.mxu0 %v1620_v28 }
 0x7e4   :  { %1510 = vmatmul.mubr.msk.f32.vlgmr.msra.gmra.mrb[22].mxu0 %vm228_vm4, %v959_v41  ;;  %v1354_v41 = vld [vmem:[%s2047_s22] ss:$0 sm:$0xff] }
 0x7e5   :  { %1531 = vmatprep.mubr.msk.f32.mxu0 %vm1619_vm0, %v1618_v3  ;;  %1563 = vmatpush3.bf16.msra.mxu0 %v1562_v31 }
 0x7e6   :  { %1564 = vmatprep.subr.bf16.mxu0 %v1620_v28 }
 0x7e9   :  { %1566 = vmatpush3.bf16.msra.mxu0 %v1565_v33 }
 0x8a3   :  { %v712_v47 = vpop.f32.mrb[16].mxu1 }
 0x8a4   :  { %v717_v48 = vmul.f32 %v1585_v46, %v712_v47  ;;  %v1478_v49 = vpop.f32.mrb[17].mxu1 }
 0x8a6   :  { %1499 = vmatmul.mubr.msk.f32.vlgmr.msra.gmra.mrb[18].mxu1 %vm228_vm4, %v717_v48 }
 0x8a7   :  { %1520 = vmatprep.mubr.msk.f32.mxu1 %vm1619_vm0, %v1618_v3  ;;  %1557 = vmatpush3.bf16.msra.mxu1 %v1556_v4 }
 0x8a8   :  { %1558 = vmatprep.subr.bf16.mxu1 %v1620_v28  ;;  %v1355_v28 = vld [vmem:[#allocation2] ss:$0 sm:$0xff] }
 0x8ab   :  { %1560 = vmatpush3.bf16.msra.mxu1 %v1559_v8 }
 0x8af   :  { %v876_v50 = vpop.f32.mrb[20].mxu0 }
 0x8b0   :  { %v1489_v51 = vpop.f32.mrb[21].mxu0 }
 0x8b7   :  { %v1028_v52 = vpop.f32.mrb[22].mxu0 }
 0x8b8   :  { %v1511_v53 = vpop.f32.mrb[23].mxu0 }
 0x8b9   :  { %v1273_v53 = vld [vmem:[%s2050_s25] sm:$0x3] }
 0x979   :  { %v949_v54 = vpop.f32.mrb[18].mxu1 }
 0x97a   :  { %v950_v55 = vadd.f32 %v949_v54, %v876_v50  ;;  %v1500_v56 = vpop.f32.mrb[19].mxu1 }
 0x97c   :  { %v1032_v57 = vadd.f32 %v1028_v52, %v950_v55 }
 0x97e   :  { %v1040_v58 = vadd.f32 %v1348_v36, %v1032_v57 }
 0x980   :  { %v1041_v59 = vmax.f32 %v1040_v58, 0.0 }
 0x982   :  { %v1045_v60 = vsel %vm1044_vm11, %v1041_v59, 0.0 }
 0x983   :  { %1046 = vadd.xlane.f32.xlu1 %v1045_v60 }
 0xa10   :  { %v1047_v61 = vpop.xlane.xlu1 %1046 }
 0xa11   :  { %v1049_v3 = vmul.f32 0.03125, %v1047_v61 }
 0xa13   :  { %v1050_v62 = vsub.f32 %v1041_v59, %v1049_v3 }
 0xa15   :  { %v1051_v63 = vmul.f32 %v1050_v62, %v1050_v62 }
 0xa17   :  { %v1052_v0 = vsel %vm1044_vm11, %v1051_v63, 0.0 }
 0xa18   :  { %1053 = vadd.xlane.f32.xlu0 %v1052_v0 }
 0xaa5   :  { %v1054_v5 = vpop.xlane.xlu0 %1053 }
 0xaa6   :  { %v1055_v9 = vmul.f32 0.03125, %v1054_v5 }
 0xaa8   :  { %v1056_v11 = vadd.f32 1e-05, %v1055_v9 }
 0xaaa   :  { %1586 = vrsqrt.f32 %v1056_v11 }
 0xab4   :  { %v1587_v12 = vpop.eup %1586 }
 0xab5   :  { %v1058_v14 = vmul.f32 %v1587_v12, %v1050_v62 }
 0xab7   :  { %v1065_v16 = vmul.f32 %v1349_v13, %v1058_v14 }
 0xab9   :  { %v1072_v17 = vadd.f32 %v1350_v15, %v1065_v16 }
 0xabb   :  { %1521 = vmatmul.mubr.msk.f32.vlgmr.msra.gmra.mrb[20].mxu1 %vm228_vm4, %v1072_v17 }
 0xb8e   :  { %v1153_v19 = vpop.f32.mrb[20].mxu1 }
 0xb8f   :  { %v1154_v20 = vadd.f32 %v1351_v18, %v1153_v19  ;;  %v1522_v21 = vpop.f32.mrb[21].mxu1 }
 0xb91   :  { %v1159_v22 = vsel %vm1044_vm11, %v1154_v20, 0.0 }
 0xb92   :  { %1160 = vadd.xlane.f32.xlu1 %v1159_v22 }
 0xc1f   :  { %v1161_v10 = vpop.xlane.xlu1 %1160 }
 0xc20   :  { %v1162_v23 = vmul.f32 0.03125, %v1161_v10 }
 0xc22   :  { %v1163_v24 = vsub.f32 %v1154_v20, %v1162_v23 }
 0xc24   :  { %v1164_v25 = vmul.f32 %v1163_v24, %v1163_v24 }
 0xc26   :  { %v1165_v26 = vsel %vm1044_vm11, %v1164_v25, 0.0 }
 0xc27   :  { %1166 = vadd.xlane.f32.xlu1 %v1165_v26 }
 0xcb4   :  { %v1167_v34 = vpop.xlane.xlu1 %1166 }
 0xcb5   :  { %v1168_v35 = vmul.f32 0.03125, %v1167_v34 }
 0xcb7   :  { %v1169_v37 = vadd.f32 1e-05, %v1168_v35 }
 0xcb9   :  { %1588 = vrsqrt.f32 %v1169_v37 }
 0xcc3   :  { %v1589_v38 = vpop.eup %1588 }
 0xcc4   :  { %v1171_v40 = vmul.f32 %v1589_v38, %v1163_v24 }
 0xcc6   :  { %v1178_v42 = vmul.f32 %v1353_v39, %v1171_v40 }
 0xcc8   :  { %v1185_v43 = vadd.f32 %v1354_v41, %v1178_v42 }
 0xcca   :  { %v1186_v44 = vmax.f32 %v1185_v43, 0.0 }
 0xccc   :  { %1532 = vmatmul.mubr.msk.f32.vlgmr.msra.gmra.mrb[24].mxu0 %vm228_vm4, %v1186_v44 }
 0xd9f   :  { %v1267_v45 = vpop.f32.mrb[24].mxu0 }
 0xda0   :  { %v1268_v46 = vadd.f32 %v1355_v28, %v1267_v45  ;;  %v1533_v47 = vpop.f32.mrb[25].mxu0 }
 0xda2   :  { %v1277_v48 = vand.u32 2147483647, %v1268_v46  ;;  %1272 = vst.msk [vmem:[%s2051_s26] sm:$0x3] %vm1271_vm12, %v1268_v46  ;;  %v1274_v54 = vmax.f32 %v1268_v46, 0.0  ;;  %v1275_v55 = vmul.f32 %v1273_v53, %v1268_v46  ;;  %s1621_s26 = smov [#allocation3]  }
 0xda3   :  { %s1308_s2 = sshll.u32 %s1621_s26, 4  ;;  %s1309_s2 = int_to_ptr.vmem [resolvable:$true] %s1308_s2 }
 0xda4   :  { %v1278_v49 = vsub.f32 0.0, %v1277_v48  ;;  %v1276_v36 = vsub.f32 %v1274_v54, %v1275_v55  ;;  %s1594_s16 = scalar_lea.vmem %s1309_s2, 16  ;;  %s1598_s3 = scalar_lea.vmem %s1309_s2, 32 }
 0xda5   :  { %p1595_p0 = scmp.ne.s32.totalorder %s1309_s2, %s1594_s16  ;;  %p1599_p1 = scmp.lt.s32.totalorder %s1309_s2, %s1309_s2 }
 0xda6   :  { %v1279_v50 = vmul.f32 1.442695, %v1278_v49  ;;  %p1600_p2 = scmp.lt.s32.totalorder %s1598_s3, %s1594_s16 }
 0xda8   :  { %1590 = vpow2.f32 %v1279_v50  ;;  %p1601_p3 = por %p1600_p2, %p1599_p1 }
 0xdaa   :  { %p1602_p4 = pnand %p1601_p3, %p1595_p0 }
 0xdb2   :  { %v1591_v51 = vpop.eup %1590 }
 0xdb3   :  { %v1281_v52 = vadd.f32 1.0, %v1591_v51 }
 0xdb5   :  { %1592 = vlog2.f32 %v1281_v52 }
 0xdbf   :  { %v1593_v56 = vpop.eup %1592 }
 0xdc0   :  { %v1283_v57 = vmul.f32 0.6931472, %v1593_v56 }
 0xdc2   :  { %v1284_v58 = vadd.f32 %v1283_v57, %v1276_v36 }
 0xdc4   :  { %v1285_v59 = vsel %vm1271_vm12, %v1284_v58, 0.0 }
 0xdc5   :  { %1286 = vadd.xlane.f32.xlu1 %v1285_v59 }
 0xe52   :  { %v1287_v60 = vpop.xlane.xlu1 %1286 }
 0xe53   :  { %v1288_v61 = vrot.slane %v1287_v60, 4 }
 0xe55   :  { %v1289_v3 = vadd.f32 %v1288_v61, %v1287_v60 }
 0xe57   :  { %v1290_v62 = vrot.slane %v1289_v3, 2 }
 0xe59   :  { %v1291_v63 = vadd.f32 %v1290_v62, %v1289_v3 }
 0xe5b   :  { %v1292_v0 = vrot.slane %v1291_v63, 1 }
 0xe5d   :  { %v1293_v1 = vadd.f32 %v1292_v0, %v1291_v63 }
 0xe5f   :  { %1567 = vpush %v1293_v1 }
 0xe90   :  { %s1568_s25 = spop %1567 }
 0xe91   :  { %v1295_v2 = vstv %s1568_s25 }
 0xe92   :  { %v1297_v4 = vmul.f32 0.5, %v1295_v2 }
 0xe94   :  { %1299 = vst.msk [vmem:[#allocation3] sm:$0x1] %vm1298_vm13, %v1297_v4 }
 0xe95   :  { %1605 = shalt.err (!%p1602_p4)
}
 0xe96   :  { %s1606_s13 = scalar_lea.hbm %s2052_s27, 16 }
 0xe97   :  { %p1607_p5 = scmp.ne.s32.totalorder %s2052_s27, %s1606_s13  ;;  %p1610_p6 = scmp.lt.u32.totalorder %s1606_s13, %s2052_s27 }
 0xe99   :  { %p1612_p7 = pnand %p1610_p6, %p1607_p5 }
 0xe9b   :  { %1615 = shalt.err (!%p1612_p7)
}
 0xe9c   :  { %1311 = dma.vmem_to_hbm [thread:$0]  %s1309_s2, 16, %s2052_s27, [#allocation4]  }
 0xe9d   :  { %1616 = dma.done.wait [#allocation4], 16  }
 0xe9e   :  { %1617 = vsyncadd [#allocation4], 4294967280 }
 0xe9f   :  { %1317 = vsyncpa [#allocation4], 1 }

</bundles_post_ra>
